<compile_context>
chip_gen: v7x
topology: tpu7x:2x2x1
jax: 0.10.0
libtpu: 0.0.40
codegen_flags: <defaults>
</compile_context>

<pallas_src>
import functools

import jax
import jax.numpy as jnp
from jax.experimental import pallas as pl
from jax.experimental.pallas import tpu as pltpu


def _round_up(n, m):
    return -(-n // m) * m


def _nconv_kernel(x_ref, a_ref, o_ref, *, V, L, W):
    # x_ref: (tb, V*L)  lane-dense input block
    # a_ref: (V, W)     adjacency, resident in VMEM (constant block index)
    # o_ref: (tb, W*L)  lane-dense output block
    tb = x_ref.shape[0]

    # In-VMEM relayout so the contraction dim V is minor on the LHS:
    # (tb, V*L) -> (tb, V, L) -> (tb, L, V) -> (tb*L, V).
    x = x_ref[...].reshape(tb, V, L)
    xt = jnp.swapaxes(x, 1, 2).reshape(tb * L, V)

    # Single batched MXU matmul for the whole block: M = tb*L, K = V, N = W.
    y = jnp.dot(xt, a_ref[...], preferred_element_type=jnp.float32)

    # Back to the einsum's (b, w, l) layout, folded lane-dense as (tb, W*L).
    y = jnp.swapaxes(y.reshape(tb, L, W), 1, 2)
    o_ref[...] = y.reshape(tb, W * L).astype(o_ref.dtype)


def _vmem_capacity_bytes():
    """Physical VMEM per TensorCore (128 MiB v5e/v6e, 64 MiB v7x)."""
    try:
        cap = getattr(pltpu.get_tpu_info(), "vmem_capacity_bytes", None)
        if cap:
            return int(cap)
    except Exception:
        pass
    return 64 * 1024 * 1024  # conservative fallback (v7x-sized) — safe everywhere


def nconv(x, A, block_b=None):
    """Pallas equivalent of torch.einsum('ncvl,vw->ncwl', x, A)."""
    N, C, V, L = x.shape
    Va, W = A.shape
    assert V == Va, "contraction dims must match"

    B = N * C
    VL, WL = V * L, W * L
    x2 = x.reshape(B, VL)  # free reshape, no transpose / data movement

    itemsize = jnp.dtype(x.dtype).itemsize
    sub = max(8, 32 // itemsize)  # sublane packing: 8 f32 / 16 bf16 / 32 int8

    # --- generation-aware VMEM budget ----------------------------------------
    vmem_cap = _vmem_capacity_bytes()
    vmem_limit = min(vmem_cap * 3 // 4, 100 * 1024 * 1024)   # ~96 MiB v5e/v6e, ~48 MiB v7x
    pipeline_budget = vmem_limit * 3 // 5                     # headroom for compiler scratch

    # Per-batch-row VMEM footprint:
    #  * double-buffered lane-dense input / output blocks,
    io_per_b = 2 * (_round_up(VL, 128) + _round_up(WL, 128)) * itemsize
    #  * in-kernel relayout / accumulation intermediates (single-buffered).
    tmp_per_b = (
        _round_up(V, sub) * _round_up(L, 128) * itemsize      # (V, L) view of x
        + _round_up(L, sub) * _round_up(V, 128) * itemsize    # (L, V) transposed LHS
        + _round_up(L, 8) * _round_up(W, 128) * 4             # (L, W) f32 matmul result
        + _round_up(W, 8) * _round_up(L, 128) * 4             # (W, L) transposed result
    )
    per_b = io_per_b + tmp_per_b
    fixed = 2 * _round_up(V, sub) * _round_up(W, 128) * itemsize  # resident A (2 buffers)

    if block_b is None:
        tb_cap = max(1, (pipeline_budget - fixed) // per_b)
        steps = -(-B // tb_cap)
        if steps > 1 and steps % 2:
            steps += 1                    # even #steps -> clean 2-TC megacore split on v7x
        tb = _round_up(-(-B // steps), sub)
        if tb >= B:
            tb = B                        # single full block (block == array dim is legal)
    else:
        tb = int(block_b)                 # testing hook (must be a multiple of `sub` or == B)
    grid = (-(-B // tb),)

    kernel = functools.partial(_nconv_kernel, V=V, L=L, W=W)

    out2 = pl.pallas_call(
        kernel,
        out_shape=jax.ShapeDtypeStruct((B, WL), x.dtype),
        grid_spec=pltpu.PrefetchScalarGridSpec(
            num_scalar_prefetch=0,
            grid=grid,
            in_specs=[
                pl.BlockSpec((tb, VL), lambda i: (i, 0)),  # lane-dense x slab
                pl.BlockSpec((V, W), lambda i: (0, 0)),    # A fetched once, stays resident
            ],
            out_specs=pl.BlockSpec((tb, WL), lambda i: (i, 0)),  # lane-dense out slab
        ),
        compiler_params=pltpu.CompilerParams(
            dimension_semantics=("parallel",),
            vmem_limit_bytes=vmem_limit,
        ),
    )(x2, A)

    # Free reshape back to (N, C, W, L); the kernel already produced the final
    # layout, so no transpose pass (and the result is contiguous).
    return out2.reshape(N, C, W, L)


if __name__ == "__main__":
    key = jax.random.PRNGKey(0)
    kx, ka = jax.random.split(key)

    # Small shapes consistent with gwnet's nconv: batch=2, channels=4,
    # num_nodes V=16 (square adjacency), seq len L=8.
    N, C, V, L = 2, 4, 16, 8
    x = jax.random.normal(kx, (N, C, V, L), dtype=jnp.float32)
    A = jax.random.normal(ka, (V, V), dtype=jnp.float32)

    out = jax.block_until_ready(nconv(x, A))
    ref = jnp.einsum("ncvl,vw->ncwl", x, A)
    assert out.shape == ref.shape == (N, C, V, L)
    assert jnp.allclose(out, ref, atol=1e-4, rtol=1e-4), "mismatch vs reference"

    # Ragged last block (B % tb != 0) and non-square adjacency (W != V).
    N2, C2, V2, W2, L2 = 3, 4, 16, 24, 8      # B = 12, forced block_b = 8 -> ragged block
    kx2, ka2 = jax.random.split(ka)
    x2 = jax.random.normal(kx2, (N2, C2, V2, L2), dtype=jnp.float32)
    A2 = jax.random.normal(ka2, (V2, W2), dtype=jnp.float32)

    out2 = jax.block_until_ready(nconv(x2, A2, block_b=8))
    ref2 = jnp.einsum("ncvl,vw->ncwl", x2, A2)
    assert out2.shape == ref2.shape == (N2, C2, W2, L2)
    assert jnp.allclose(out2, ref2, atol=1e-4, rtol=1e-4), "ragged/non-square mismatch"

    print("KERNEL_OK")
</pallas_src>

<mosaic_0001>
module attributes {stable_mosaic.version = 11 : i64} {
  func.func @_nconv_kernel(%arg0: i32, %arg1: memref<8x128xf32, #tpu.memory_space<vmem>>, %arg2: memref<16x16xf32, #tpu.memory_space<vmem>>, %arg3: memref<8x128xf32, #tpu.memory_space<vmem>>) attributes {dimension_semantics = [#tpu.dimension_semantics<parallel>], iteration_bounds = array<i64: 1>, scalar_prefetch = 0 : i64, scratch_operands = 0 : i64, tpu.core_type = #tpu.core_type<tc>, window_params = [{transform_indices = @transform_0, window_bounds = array<i64: 8, 128>}, {pipeline_mode = #tpu.pipeline_mode<synchronous>, transform_indices = @transform_1, window_bounds = array<i64: 16, 16>}, {transform_indices = @transform_2, window_bounds = array<i64: 8, 128>}]} {
    %c0 = arith.constant 0 : index
    %c0_0 = arith.constant 0 : index
    %0 = vector.load %arg1[%c0, %c0_0] : memref<8x128xf32, #tpu.memory_space<vmem>>, vector<8x128xf32>
    %1 = vector.shape_cast %0 : vector<8x128xf32> to vector<8x16x8xf32>
    %2 = tpu.transpose %1, [0, 2, 1] : vector<8x16x8xf32> -> vector<8x8x16xf32>
    %3 = vector.shape_cast %2 : vector<8x8x16xf32> to vector<64x16xf32>
    %c0_1 = arith.constant 0 : index
    %c0_2 = arith.constant 0 : index
    %4 = vector.load %arg2[%c0_1, %c0_2] : memref<16x16xf32, #tpu.memory_space<vmem>>, vector<16x16xf32>
    %cst = arith.constant dense<0.000000e+00> : vector<64x16xf32>
    %5 = tpu.matmul %3, %4, %cst {dimension_numbers = #tpu.dot_dimension_numbers<[1], [0], [0], [1], [0, 0, 1, 1], [], []>} : vector<64x16xf32>, vector<16x16xf32>, vector<64x16xf32> -> vector<64x16xf32>
    %6 = vector.shape_cast %5 : vector<64x16xf32> to vector<8x8x16xf32>
    %7 = tpu.transpose %6, [0, 2, 1] : vector<8x8x16xf32> -> vector<8x16x8xf32>
    %8 = vector.shape_cast %7 : vector<8x16x8xf32> to vector<8x128xf32>
    %c0_3 = arith.constant 0 : index
    %c0_4 = arith.constant 0 : index
    %9 = vector.load %arg3[%c0_3, %c0_4] : memref<8x128xf32, #tpu.memory_space<vmem>>, vector<8x128xf32>
    tpu.vector_store %arg3[%c0_3, %c0_4], %8 {strides = array<i32>} : memref<8x128xf32, #tpu.memory_space<vmem>>, vector<8x128xf32>,
    return
  }
  func.func @transform_0(%arg0: i32) -> (i32, i32) {
    %c0_i32 = arith.constant 0 : i32
    %c0_i32_0 = arith.constant 0 : i32
    return %arg0, %c0_i32 : i32, i32
  }
  func.func @transform_1(%arg0: i32) -> (i32, i32) {
    %c0_i32 = arith.constant 0 : i32
    %c0_i32_0 = arith.constant 0 : i32
    %c0_i32_1 = arith.constant 0 : i32
    return %c0_i32, %c0_i32_0 : i32, i32
  }
  func.func @transform_2(%arg0: i32) -> (i32, i32) {
    %c0_i32 = arith.constant 0 : i32
    %c0_i32_0 = arith.constant 0 : i32
    return %arg0, %c0_i32 : i32, i32
  }
}

</mosaic_0001>

<bundles_post_ra>
// kernel: tpu_custom_call.1
= control target key start
LH: loop header
LB: loop body
LE: loop exit
PB: predicated region body
PF: predicated region fallthrough
CT: control target
= control target key end

     0   :  { %7 = vsyncpa [#allocation3], 0  ;;  %s1756_s0 = inlined_call_operand.hbm [shape: f32[8,128], index: 0, kind: input, shape index: {}]   ;;  %s1757_s1 = inlined_call_operand.hbm [shape: f32[16,16], index: 1, kind: input, shape index: {}]   ;;  %s1758_s2 = inlined_call_operand.hbm [shape: f32[8,128], index: 2, kind: output, shape index: {}]  }
   0x1   :  { %8 = vsyncpa [#allocation6], 0 }
   0x2   :  { %9 = vsyncpa [#allocation4], 0  ;;  %s1513_s9 = smov [#allocation2]   ;;  %s1514_s11 = smov [#allocation5]  }
   0x3   :  { %s16_s10 = sshll.u32 %s1513_s9, 4  ;;  %s25_s12 = sshll.u32 %s1514_s11, 4  ;;  %s17_s10 = int_to_ptr.vmem [resolvable:$true] %s16_s10  ;;  %s1549_s12 = int_to_ptr.vmem [resolvable:$true] %s25_s12 }
   0x4   :  { %s1441_s15 = scalar_lea.hbm %s1756_s0, 128 }
   0x5   :  { %p1442_p0 = scmp.ne.s32.totalorder %s1756_s0, %s1441_s15  ;;  %p1445_p1 = scmp.lt.u32.totalorder %s1441_s15, %s1756_s0 }
   0x7   :  { %p1447_p2 = pnand %p1445_p1, %p1442_p0 }
   0x9   :  { %1450 = shalt.err (!%p1447_p2)
}
   0xa   :  { %s1451_s20 = scalar_lea.vmem %s17_s10, 128  ;;  %p1456_p4 = scmp.lt.s32.totalorder %s17_s10, %s17_s10 }
   0xb   :  { %p1452_p3 = scmp.ne.s32.totalorder %s17_s10, %s1451_s20  ;;  %p1457_p5 = scmp.lt.s32.totalorder %s1451_s20, %s1451_s20 }
   0xd   :  { %p1458_p6 = por %p1457_p5, %p1456_p4 }
   0xf   :  { %p1459_p7 = pnand %p1458_p6, %p1452_p3 }
  0x11   :  { %1462 = shalt.err (!%p1459_p7)
}
  0x12   :  { %19 = dma.hbm_to_vmem [thread:$0]  %s1756_s0, 128, %s17_s10, [#allocation3]  }
  0x13   :  { %s1463_s25 = scalar_lea.hbm %s1757_s1, 256 }
  0x14   :  { %p1464_p8 = scmp.ne.s32.totalorder %s1757_s1, %s1463_s25  ;;  %p1467_p9 = scmp.lt.u32.totalorder %s1463_s25, %s1757_s1 }
  0x16   :  { %p1469_p10 = pnand %p1467_p9, %p1464_p8 }
  0x18   :  { %1472 = shalt.err (!%p1469_p10)
}
  0x19   :  { %s1473_s30 = scalar_lea.vmem %s1549_s12, 256  ;;  %p1478_p12 = scmp.lt.s32.totalorder %s1549_s12, %s1549_s12 }
  0x1a   :  { %p1474_p11 = scmp.ne.s32.totalorder %s1549_s12, %s1473_s30  ;;  %p1479_p13 = scmp.lt.s32.totalorder %s1473_s30, %s1473_s30 }
  0x1c   :  { %p1480_p0 = por %p1479_p13, %p1478_p12 }
  0x1e   :  { %p1481_p1 = pnand %p1480_p0, %p1474_p11 }
  0x20   :  { %1484 = shalt.err (!%p1481_p1)
}
  0x21   :  { %s1515_s0 = smov 128   ;;  %s1516_s3 = smov 8  }
  0x22   :  { %31 = dma.hbm_to_vmem [thread:$0]  %s1757_s1, 256, %s1549_s12, [#allocation6], %s1515_s0, %s1515_s0, %s1516_s3  }
  0x23   :  { %1507 = dma.done.wait [#allocation3], 128  }
  0x24   :  { %1508 = vsyncadd [#allocation3], 4294967168 }
  0x25   :  { %1509 = dma.done.wait [#allocation6], 256  }
  0x26   :  { %1510 = vsyncadd [#allocation6], 4294967040  ;;  %v38_v0 = vld [vmem:[#allocation2] sm:$0xff]  ;;  %s1517_s6 = smov 104   ;;  %s1518_s7 = smov 120   ;;  %v90_v4 = vlaneseq  ;;  %vm615_vm0 = vcmask 130048  }
  0x27   :  { %46 = vrot.lane.b32.xlu1 %v38_v0, %s1517_s6  ;;  %40 = vrot.lane.b32.xlu0 %v38_v0, %s1518_s7  ;;  %s1519_s8 = smov 96   ;;  %s1520_s9 = smov 112   ;;  %v1531_v2 = vmov 1983009808   ;;  %v1532_v12 = vmov 1934713408  }
  0x28   :  { %s1521_s10 = smov 80   ;;  %s1522_s1 = smov 88   ;;  %v88_v3 = vunpack.c.l.s4 %v1531_v2  ;;  %v91_v7 = vshrl.u32 %v90_v4, 7  ;;  %v152_v13 = vunpack.c.l.s4 %v1532_v12  ;;  %v613_v12 = vld [vmem:[#allocation5] sm:$0xff]  ;;  %vm1333_vm1 = vcmask 64512  }
  0x29   :  { %s1523_s11 = smov 64   ;;  %s1524_s12 = smov 72   ;;  %vm1336_vm2 = vcmask 195584   ;;  %vm1338_vm3 = vcmask 261120   ;;  %vm1340_vm4 = vcmask 326656   ;;  %vm1342_vm5 = vcmask 392192  }
  0x2a   :  { %s1525_s13 = smov 48   ;;  %s1526_s14 = smov 56   ;;  %v89_v6 = vunpack.c.0.s8 %v88_v3  ;;  %v153_v21 = vunpack.c.0.s8 %v152_v13  ;;  %v614_v13 = vld [vmem:[#allocation5 + $0x8] sm:$0xff]  ;;  %vm1344_vm6 = vcmask 457728   ;;  %vm1346_vm7 = vcmask 523264  }
  0x2b   :  { %49 = vrot.lane.b32.xlu1 %v38_v0, %s1519_s8  ;;  %43 = vrot.lane.b32.xlu0 %v38_v0, %s1520_s9  ;;  %s1527_s15 = smov 32   ;;  %s1528_s16 = smov 40   ;;  %vm1348_vm8 = vcmask 588800   ;;  %vm1350_vm9 = vcmask 654336   ;;  %vm1352_vm10 = vcmask 719872   ;;  %vm1354_vm11 = vcmask 785408  }
  0x2c   :  { %s1529_s17 = smov 16   ;;  %s1530_s18 = smov 24   ;;  %v1596_v14 = vsub.s32 %v89_v6, %v91_v7  ;;  %v1610_v30 = vsub.s32 %v153_v21, %v91_v7  ;;  %vm1356_vm12 = vcmask 850944   ;;  %vm1358_vm13 = vcmask 916480  }
  0x2d   :  { %s1533_s19 = smov [#allocation7]   ;;  %vm1360_vm14 = vcmask 982016  }
  0x2e   :  { %s1369_s20 = sshll.u32 %s1533_s19, 4  ;;  %s1370_s20 = int_to_ptr.vmem [resolvable:$true] %s1369_s20 }
  0x2f   :  { %55 = vrot.lane.b32.xlu1 %v38_v0, %s1521_s10  ;;  %52 = vrot.lane.b32.xlu0 %v38_v0, %s1522_s1  ;;  %s1485_s21 = scalar_lea.vmem %s1370_s20, 128  ;;  %p1490_p3 = scmp.lt.s32.totalorder %s1370_s20, %s1370_s20 }
  0x30   :  { %p1486_p2 = scmp.ne.s32.totalorder %s1370_s20, %s1485_s21  ;;  %p1491_p4 = scmp.lt.s32.totalorder %s1485_s21, %s1485_s21 }
  0x32   :  { %p1492_p5 = por %p1491_p4, %p1490_p3 }
  0x33   :  { %61 = vrot.lane.b32.xlu1 %v38_v0, %s1523_s11  ;;  %58 = vrot.lane.b32.xlu0 %v38_v0, %s1524_s12 }
  0x34   :  { %p1493_p6 = pnand %p1492_p5, %p1486_p2 }
  0x37   :  { %67 = vrot.lane.b32.xlu1 %v38_v0, %s1525_s13  ;;  %64 = vrot.lane.b32.xlu0 %v38_v0, %s1526_s14 }
  0x3b   :  { %73 = vrot.lane.b32.xlu1 %v38_v0, %s1527_s15  ;;  %70 = vrot.lane.b32.xlu0 %v38_v0, %s1528_s16 }
  0x3f   :  { %79 = vrot.lane.b32.xlu1 %v38_v0, %s1529_s17  ;;  %76 = vrot.lane.b32.xlu0 %v38_v0, %s1530_s18 }
  0x43   :  { %82 = vrot.lane.b32.xlu0 %v38_v0, %s1516_s3 }
  0x99   :  { %v47_v1 = vpop.permute.xlu1 %46  ;;  %v41_v5 = vpop.permute.xlu0 %40 }
  0x9a   :  { %v101_v15 = vcombine.low %v41_v5, %v47_v1  ;;  %v102_v16 = vcombine.high %v41_v5, %v47_v1 }
  0x9c   :  { %v1605_v24 = vrot.slane %v101_v15, %v1596_v14  ;;  %v1608_v25 = vrot.slane %v102_v16, %v1596_v14  ;;  %v1413_v15 = vpack.c.bf16 %v614_v13, %v613_v12 }
  0x9d   :  { %v50_v8 = vpop.permute.xlu1 %49  ;;  %v44_v9 = vpop.permute.xlu0 %43 }
  0x9e   :  { %v85_v10 = vcombine.low %v38_v0, %v44_v9  ;;  %v86_v11 = vcombine.high %v38_v0, %v44_v9  ;;  %1414 = vmatprep.subr.bf16.mxu0 %v1413_v15  ;;  %1417 = vmatprep.subr.bf16.mxu1 %v1413_v15 }
  0x9f   :  { %1416 = vmatpush3.bf16.msra.mxu0 %v1413_v15  ;;  %1418 = vmatpush3.bf16.msra.mxu1 %v1413_v15 }
  0xa0   :  { %v1599_v19 = vrot.slane %v85_v10, %v1596_v14  ;;  %v1602_v20 = vrot.slane %v86_v11, %v1596_v14 }
  0xa1   :  { %v56_v17 = vpop.permute.xlu1 %55  ;;  %v53_v18 = vpop.permute.xlu0 %52 }
  0xa2   :  { %v117_v22 = vcombine.low %v50_v8, %v56_v17  ;;  %v118_v23 = vcombine.high %v50_v8, %v56_v17  ;;  %v165_v31 = vcombine.low %v1602_v20, %v1608_v25  ;;  %v149_v32 = vcombine.low %v1599_v19, %v1605_v24 }
  0xa4   :  { %v1617_v33 = vrot.slane %v117_v22, %v1596_v14  ;;  %v1620_v34 = vrot.slane %v118_v23, %v1596_v14  ;;  %v173_v41 = vrot.slane %v165_v31, %v1610_v30  ;;  %v157_v43 = vrot.slane %v149_v32, %v1610_v30 }
  0xa5   :  { %v62_v26 = vpop.permute.xlu1 %61  ;;  %v59_v27 = vpop.permute.xlu0 %58 }
  0xa6   :  { %v133_v28 = vcombine.low %v53_v18, %v59_v27  ;;  %v134_v29 = vcombine.high %v53_v18, %v59_v27  ;;  %v166_v27 = vcombine.high %v1602_v20, %v1608_v25 }
  0xa8   :  { %v1623_v35 = vrot.slane %v133_v28, %v1596_v14  ;;  %v1626_v36 = vrot.slane %v134_v29, %v1596_v14 }
  0xa9   :  { %v68_v37 = vpop.permute.xlu1 %67  ;;  %v65_v38 = vpop.permute.xlu0 %64 }
  0xaa   :  { %v197_v39 = vcombine.low %v1620_v34, %v1626_v36  ;;  %v181_v40 = vcombine.low %v1617_v33, %v1623_v35  ;;  %v221_v51 = vcombine.low %v62_v26, %v68_v37  ;;  %v222_v52 = vcombine.high %v62_v26, %v68_v37 }
  0xab   :  { %v182_v18 = vcombine.high %v1617_v33, %v1623_v35  ;;  %v198_v21 = vcombine.high %v1620_v34, %v1626_v36  ;;  %v150_v26 = vcombine.high %v1599_v19, %v1605_v24  ;;  %v180_v19 = vrot.slane %v166_v27, %v1610_v30 }
  0xac   :  { %v205_v42 = vrot.slane %v197_v39, %v1610_v30  ;;  %v189_v44 = vrot.slane %v181_v40, %v1610_v30  ;;  %v229_v59 = vrot.slane %v221_v51, %v1596_v14  ;;  %v236_v60 = vrot.slane %v222_v52, %v1596_v14 }
  0xad   :  { %v74_v45 = vpop.permute.xlu1 %73  ;;  %v71_v46 = vpop.permute.xlu0 %70  ;;  %v196_v28 = vrot.slane %v182_v18, %v1610_v30  ;;  %v212_v29 = vrot.slane %v198_v21, %v1610_v30  ;;  %v164_v35 = vrot.slane %v150_v26, %v1610_v30 }
  0xae   :  { %v217_v47 = vcombine.low %v173_v41, %v205_v42  ;;  %v213_v48 = vcombine.low %v157_v43, %v189_v44  ;;  %v237_v49 = vcombine.low %v65_v38, %v71_v46  ;;  %v238_v50 = vcombine.high %v65_v38, %v71_v46 }
  0xaf   :  { %v214_v22 = vcombine.high %v157_v43, %v189_v44  ;;  %v218_v23 = vcombine.high %v173_v41, %v205_v42  ;;  %v215_v24 = vcombine.low %v164_v35, %v196_v28  ;;  %v219_v38 = vcombine.low %v180_v19, %v212_v29 }
  0xb0   :  { %485 = vxpose.xlu0.b32.start [1/2] (short) (narrow) %v217_v47, 8  ;;  %357 = vxpose.xlu1.b32.start [1/2] (short) (narrow) %v213_v48, 8  ;;  %v245_v55 = vrot.slane %v237_v49, %v1596_v14  ;;  %v252_v56 = vrot.slane %v238_v50, %v1596_v14  ;;  %v216_v43 = vcombine.high %v164_v35, %v196_v28 }
  0xb1   :  { %v80_v53 = vpop.permute.xlu1 %79  ;;  %v77_v54 = vpop.permute.xlu0 %76  ;;  %v220_v44 = vcombine.high %v180_v19, %v212_v29 }
  0xb2   :  { %v253_v57 = vcombine.low %v74_v45, %v80_v53  ;;  %v254_v58 = vcombine.high %v74_v45, %v80_v53  ;;  %v285_v0 = vcombine.low %v229_v59, %v245_v55  ;;  %v301_v1 = vcombine.low %v236_v60, %v252_v56 }
  0xb3   :  { %v286_v36 = vcombine.high %v229_v59, %v245_v55  ;;  %v302_v37 = vcombine.high %v236_v60, %v252_v56 }
  0xb4   :  { %v261_v2 = vrot.slane %v253_v57, %v1596_v14  ;;  %v268_v3 = vrot.slane %v254_v58, %v1596_v14  ;;  %v309_v8 = vrot.slane %v301_v1, %v1610_v30  ;;  %v293_v10 = vrot.slane %v285_v0, %v1610_v30 }
  0xb5   :  { %v83_v61 = vpop.permute.xlu0 %82  ;;  %v300_v39 = vrot.slane %v286_v36, %v1610_v30  ;;  %v316_v40 = vrot.slane %v302_v37, %v1610_v30 }
  0xb6   :  { %v269_v62 = vcombine.low %v77_v54, %v83_v61  ;;  %v270_v63 = vcombine.high %v77_v54, %v83_v61 }
  0xb8   :  { %v277_v4 = vrot.slane %v269_v62, %v1596_v14  ;;  %v284_v5 = vrot.slane %v270_v63, %v1596_v14 }
  0xba   :  { %v317_v6 = vcombine.low %v261_v2, %v277_v4  ;;  %v333_v7 = vcombine.low %v268_v3, %v284_v5  ;;  %v318_v31 = vcombine.high %v261_v2, %v277_v4  ;;  %v334_v32 = vcombine.high %v268_v3, %v284_v5 }
  0xbc   :  { %v341_v9 = vrot.slane %v333_v7, %v1610_v30  ;;  %v325_v11 = vrot.slane %v317_v6, %v1610_v30  ;;  %v332_v20 = vrot.slane %v318_v31, %v1610_v30  ;;  %v348_v25 = vrot.slane %v334_v32, %v1610_v30 }
  0xbe   :  { %v353_v16 = vcombine.low %v309_v8, %v341_v9  ;;  %v349_v17 = vcombine.low %v293_v10, %v325_v11  ;;  %v350_v33 = vcombine.high %v293_v10, %v325_v11  ;;  %v354_v34 = vcombine.high %v309_v8, %v341_v9 }
  0xbf   :  { %v351_v41 = vcombine.low %v300_v39, %v332_v20  ;;  %v355_v42 = vcombine.low %v316_v40, %v348_v25  ;;  %v352_v45 = vcombine.high %v300_v39, %v332_v20  ;;  %v356_v46 = vcombine.high %v316_v40, %v348_v25 }
  0xc0   :  { %486 = vxpose.xlu0.b32.end [2/2] (short) (narrow) %v353_v16, 8  ;;  %358 = vxpose.xlu1.b32.end [2/2] (short) (narrow) %v349_v17, 8 }
  0xc4   :  { %389 = vxpose.xlu0.b32.start [1/2] (short) (narrow) %v214_v22, 8  ;;  %517 = vxpose.xlu1.b32.start [1/2] (short) (narrow) %v218_v23, 8 }
  0xc8   :  { %390 = vxpose.xlu0.b32.end [2/2] (short) (narrow) %v350_v33, 8  ;;  %518 = vxpose.xlu1.b32.end [2/2] (short) (narrow) %v354_v34, 8 }
  0xcc   :  { %421 = vxpose.xlu0.b32.start [1/2] (short) (narrow) %v215_v24, 8  ;;  %549 = vxpose.xlu1.b32.start [1/2] (short) (narrow) %v219_v38, 8 }
  0xd0   :  { %422 = vxpose.xlu0.b32.end [2/2] (short) (narrow) %v351_v41, 8  ;;  %550 = vxpose.xlu1.b32.end [2/2] (short) (narrow) %v355_v42, 8 }
  0xd4   :  { %453 = vxpose.xlu0.b32.start [1/2] (short) (narrow) %v216_v43, 8  ;;  %581 = vxpose.xlu1.b32.start [1/2] (short) (narrow) %v220_v44, 8 }
  0xd8   :  { %454 = vxpose.xlu0.b32.end [2/2] (short) (narrow) %v352_v45, 8  ;;  %582 = vxpose.xlu1.b32.end [2/2] (short) (narrow) %v356_v46, 8 }
 0x13c   :  { %v501_v47 = vpop.trf.xlu0  ;;  %v373_v48 = vpop.trf.xlu1 }
 0x13d   :  { %1407 = vmatprep.mubr.msk.f32.mxu1 %vm615_vm0, %v501_v47  ;;  %1401 = vmatprep.mubr.msk.f32.mxu0 %vm615_vm0, %v373_v48 }
 0x144   :  { %v405_v49 = vpop.trf.xlu0  ;;  %v533_v50 = vpop.trf.xlu1 }
 0x145   :  { %1402 = vmatmul.mubr.msk.f32.vlgmr.msra.gmra.mrb[0].mxu0 %vm615_vm0, %v405_v49  ;;  %1408 = vmatmul.mubr.msk.f32.vlgmr.msra.gmra.mrb[0].mxu1 %vm615_vm0, %v533_v50 }
 0x14c   :  { %v437_v51 = vpop.trf.xlu0  ;;  %v565_v52 = vpop.trf.xlu1 }
 0x14d   :  { %1404 = vmatprep.mubr.msk.f32.mxu0 %vm615_vm0, %v437_v51  ;;  %1410 = vmatprep.mubr.msk.f32.mxu1 %vm615_vm0, %v565_v52 }
 0x154   :  { %v469_v53 = vpop.trf.xlu0  ;;  %v597_v54 = vpop.trf.xlu1 }
 0x155   :  { %1405 = vmatmul.mubr.msk.f32.gmra.mrb[2].mxu0 %vm615_vm0, %v469_v53  ;;  %1411 = vmatmul.mubr.msk.f32.gmra.mrb[2].mxu1 %vm615_vm0, %v597_v54 }
 0x218   :  { %v1403_v55 = vpop.f32.mrb[0].mxu0  ;;  %v1409_v56 = vpop.f32.mrb[0].mxu1 }
 0x219   :  { %777 = vxpose.xlu0.b32.start.end [1/1] (short) (narrow) %v1403_v55, 16  ;;  %v706_v57 = vpop.f32.mrb[1].mxu0  ;;  %v726_v58 = vpop.f32.mrb[1].mxu1 }
 0x21a   :  { %873 = vxpose.xlu1.b32.start.end [1/1] (short) (narrow) %v726_v58, 16 }
 0x21e   :  { %905 = vxpose.xlu0.b32.start.end [1/1] (short) (narrow) %v1409_v56, 16 }
 0x223   :  { %745 = vxpose.xlu0.b32.start.end [1/1] (short) (narrow) %v706_v57, 16 }
 0x228   :  { %v1406_v59 = vpop.f32.mrb[2].mxu0  ;;  %v1412_v60 = vpop.f32.mrb[2].mxu1 }
 0x229   :  { %v716_v61 = vpop.f32.mrb[3].mxu0  ;;  %841 = vxpose.xlu0.b32.start.end [1/1] (short) (narrow) %v1406_v59, 16  ;;  %v736_v62 = vpop.f32.mrb[3].mxu1 }
 0x22a   :  { %809 = vxpose.xlu1.b32.start.end [1/1] (short) (narrow) %v716_v61, 16 }
 0x22e   :  { %969 = vxpose.xlu0.b32.start.end [1/1] (short) (narrow) %v1412_v60, 16 }
 0x22f   :  { %937 = vxpose.xlu1.b32.start.end [1/1] (short) (narrow) %v736_v62, 16 }
 0x299   :  { %v793_v63 = vpop.trf.xlu0 }
 0x29a   :  { %v889_v1 = vpop.trf.xlu1 }
 0x29d   :  { %v1672_v0 = vpop.trf.xlu0 }
 0x29e   :  { %v1674_v3 = vpop.trf.xlu1 }
 0x2a1   :  { %v921_v2 = vpop.trf.xlu0 }
 0x2a5   :  { %v922_v4 = vpop.trf.xlu0 }
 0x2a9   :  { %v761_v5 = vpop.trf.xlu0 }
 0x2aa   :  { %v825_v6 = vpop.trf.xlu1 }
 0x2ab   :  { %v1001_v13 = vcombine.low %v761_v5, %v825_v6  ;;  %v1002_v21 = vcombine.high %v761_v5, %v825_v6 }
 0x2ad   :  { %v1676_v7 = vpop.trf.xlu0  ;;  %v1009_v26 = vrot.slane %v1001_v13, %v1596_v14  ;;  %v1016_v19 = vrot.slane %v1002_v21, %v1596_v14 }
 0x2ae   :  { %v1678_v8 = vpop.trf.xlu1 }
 0x2af   :  { %v1137_v24 = vcombine.low %v1676_v7, %v1678_v8  ;;  %v1138_v62 = vcombine.high %v1676_v7, %v1678_v8 }
 0x2b1   :  { %v857_v9 = vpop.trf.xlu0  ;;  %v1145_v48 = vrot.slane %v1137_v24, %v1596_v14 }
 0x2b2   :  { %v953_v10 = vpop.trf.xlu1  ;;  %v1017_v11 = vcombine.low %v793_v63, %v857_v9  ;;  %v1018_v15 = vcombine.high %v793_v63, %v857_v9 }
 0x2b3   :  { %v1033_v16 = vcombine.low %v889_v1, %v953_v10  ;;  %v1034_v17 = vcombine.high %v889_v1, %v953_v10 }
 0x2b4   :  { %v1025_v18 = vrot.slane %v1017_v11, %v1596_v14  ;;  %v1032_v29 = vrot.slane %v1018_v15, %v1596_v14  ;;  %v1152_v11 = vrot.slane %v1138_v62, %v1596_v14 }
 0x2b5   :  { %v858_v12 = vpop.trf.xlu0  ;;  %v1041_v31 = vrot.slane %v1033_v16, %v1596_v14  ;;  %v1048_v32 = vrot.slane %v1034_v17, %v1596_v14 }
 0x2b6   :  { %v954_v22 = vpop.trf.xlu1  ;;  %v1153_v33 = vcombine.low %v1672_v0, %v858_v12  ;;  %v1066_v34 = vcombine.high %v1009_v26, %v1025_v18  ;;  %v1065_v20 = vcombine.low %v1009_v26, %v1025_v18  ;;  %v1082_v41 = vcombine.high %v1016_v19, %v1032_v29 }
 0x2b7   :  { %v1169_v35 = vcombine.low %v1674_v3, %v954_v22  ;;  %v1154_v58 = vcombine.high %v1672_v0, %v858_v12  ;;  %v1170_v60 = vcombine.high %v1674_v3, %v954_v22  ;;  %v1081_v63 = vcombine.low %v1016_v19, %v1032_v29 }
 0x2b8   :  { %v1161_v42 = vrot.slane %v1153_v33, %v1596_v14  ;;  %v1080_v46 = vrot.slane %v1066_v34, %v1610_v30  ;;  %v1699_v49 = vrot.slane %v1065_v20, %v1610_v30  ;;  %v1096_v61 = vrot.slane %v1082_v41, %v1610_v30 }
 0x2b9   :  { %v985_v23 = vpop.trf.xlu0  ;;  %v1177_v44 = vrot.slane %v1169_v35, %v1596_v14  ;;  %v1168_v3 = vrot.slane %v1154_v58, %v1596_v14  ;;  %v1184_v10 = vrot.slane %v1170_v60, %v1596_v14  ;;  %v1089_v8 = vrot.slane %v1081_v63, %v1610_v30 }
 0x2ba   :  { %v1049_v27 = vcombine.low %v921_v2, %v985_v23  ;;  %v1050_v28 = vcombine.high %v921_v2, %v985_v23  ;;  %v1201_v59 = vcombine.low %v1145_v48, %v1161_v42  ;;  %v1202_v9 = vcombine.high %v1145_v48, %v1161_v42 }
 0x2bb   :  { %v1217_v17 = vcombine.low %v1152_v11, %v1168_v3 }
 0x2bc   :  { %v1057_v36 = vrot.slane %v1049_v27, %v1596_v14  ;;  %v1064_v37 = vrot.slane %v1050_v28, %v1596_v14  ;;  %v1209_v7 = vrot.slane %v1201_v59, %v1610_v30  ;;  %v1216_v18 = vrot.slane %v1202_v9, %v1610_v30 }
 0x2bd   :  { %v986_v38 = vpop.trf.xlu0  ;;  %v1218_v27 = vcombine.high %v1152_v11, %v1168_v3 }
 0x2be   :  { %v1098_v25 = vcombine.high %v1041_v31, %v1057_v36  ;;  %v1114_v39 = vcombine.high %v1048_v32, %v1064_v37  ;;  %v1185_v40 = vcombine.low %v922_v4, %v986_v38  ;;  %v1097_v43 = vcombine.low %v1041_v31, %v1057_v36 }
 0x2bf   :  { %v1186_v51 = vcombine.high %v922_v4, %v986_v38  ;;  %v1113_v55 = vcombine.low %v1048_v32, %v1064_v37  ;;  %v1232_v32 = vrot.slane %v1218_v27, %v1610_v30 }
 0x2c0   :  { %v1193_v45 = vrot.slane %v1185_v40, %v1596_v14  ;;  %v1112_v47 = vrot.slane %v1098_v25, %v1610_v30  ;;  %v1702_v50 = vrot.slane %v1097_v43, %v1610_v30  ;;  %v1128_v54 = vrot.slane %v1114_v39, %v1610_v30 }
 0x2c1   :  { %v1200_v1 = vrot.slane %v1186_v51, %v1596_v14  ;;  %v1121_v6 = vrot.slane %v1113_v55, %v1610_v30  ;;  %v1225_v14 = vrot.slane %v1217_v17, %v1610_v30 }
 0x2c2   :  { %v1233_v52 = vcombine.low %v1177_v44, %v1193_v45  ;;  %v1131_v53 = vcombine.low %v1080_v46, %v1112_v47  ;;  %v1130_v56 = vcombine.high %v1699_v49, %v1702_v50  ;;  %v1129_v57 = vcombine.low %v1699_v49, %v1702_v50 }
 0x2c3   :  { %v1234_v2 = vcombine.high %v1177_v44, %v1193_v45  ;;  %v1136_v4 = vcombine.high %v1096_v61, %v1128_v54  ;;  %v1132_v0 = vcombine.high %v1080_v46, %v1112_v47  ;;  %v1249_v12 = vcombine.low %v1184_v10, %v1200_v1 }
 0x2c4   :  { %1278 = vrot.lane.b32.xlu0 %v1131_v53, %s1529_s17  ;;  %1274 = vrot.lane.b32.xlu1 %v1130_v56, %s1516_s3  ;;  %v1241_v5 = vrot.slane %v1233_v52, %v1610_v30  ;;  %v1133_v16 = vcombine.low %v1089_v8, %v1121_v6  ;;  %v1250_v21 = vcombine.high %v1184_v10, %v1200_v1 }
 0x2c5   :  { %v1248_v15 = vrot.slane %v1234_v2, %v1610_v30  ;;  %v1257_v23 = vrot.slane %v1249_v12, %v1610_v30  ;;  %v1134_v26 = vcombine.high %v1089_v8, %v1121_v6  ;;  %v1135_v31 = vcombine.low %v1096_v61, %v1128_v54 }
 0x2c6   :  { %v1266_v13 = vcombine.high %v1209_v7, %v1241_v5  ;;  %v1264_v29 = vrot.slane %v1250_v21, %v1610_v30  ;;  %v1265_v34 = vcombine.low %v1209_v7, %v1241_v5 }
 0x2c7   :  { %v1268_v22 = vcombine.high %v1216_v18, %v1248_v15  ;;  %v1270_v28 = vcombine.high %v1225_v14, %v1257_v23  ;;  %v1267_v35 = vcombine.low %v1216_v18, %v1248_v15  ;;  %v1269_v36 = vcombine.low %v1225_v14, %v1257_v23 }
 0x2c8   :  { %1298 = vrot.lane.b32.xlu0 %v1136_v4, %s1526_s14  ;;  %1282 = vrot.lane.b32.xlu1 %v1132_v0, %s1530_s18  ;;  %v1272_v33 = vcombine.high %v1232_v32, %v1264_v29  ;;  %v1271_v37 = vcombine.low %v1232_v32, %v1264_v29 }
 0x2cc   :  { %1306 = vrot.lane.b32.xlu0 %v1266_v13, %s1524_s12  ;;  %1286 = vrot.lane.b32.xlu1 %v1133_v16, %s1527_s15 }
 0x2d0   :  { %1314 = vrot.lane.b32.xlu0 %v1268_v22, %s1522_s1  ;;  %1290 = vrot.lane.b32.xlu1 %v1134_v26, %s1528_s16 }
 0x2d4   :  { %1322 = vrot.lane.b32.xlu0 %v1270_v28, %s1517_s6  ;;  %1294 = vrot.lane.b32.xlu1 %v1135_v31, %s1525_s13 }
 0x2d8   :  { %1330 = vrot.lane.b32.xlu0 %v1272_v33, %s1518_s7  ;;  %1302 = vrot.lane.b32.xlu1 %v1265_v34, %s1523_s11 }
 0x2dc   :  { %1310 = vrot.lane.b32.xlu1 %v1267_v35, %s1521_s10 }
 0x2e0   :  { %1318 = vrot.lane.b32.xlu1 %v1269_v36, %s1519_s8 }
 0x2e4   :  { %1326 = vrot.lane.b32.xlu1 %v1271_v37, %s1520_s9 }
 0x336   :  { %v1275_v19 = vpop.permute.xlu1 %1274  ;;  %v1279_v24 = vpop.permute.xlu0 %1278 }
 0x337   :  { %v1334_v25 = vsel %vm1333_vm1, %v1129_v57, %v1275_v19 }
 0x338   :  { %v1335_v40 = vsel %vm615_vm0, %v1334_v25, %v1279_v24 }
 0x33a   :  { %v1283_v30 = vpop.permute.xlu1 %1282  ;;  %v1299_v20 = vpop.permute.xlu0 %1298 }
 0x33b   :  { %v1337_v41 = vsel %vm1336_vm2, %v1335_v40, %v1283_v30 }
 0x33e   :  { %v1287_v38 = vpop.permute.xlu1 %1286  ;;  %v1307_v42 = vpop.permute.xlu0 %1306 }
 0x33f   :  { %v1339_v43 = vsel %vm1338_vm3, %v1337_v41, %v1287_v38 }
 0x342   :  { %v1291_v39 = vpop.permute.xlu1 %1290  ;;  %v1315_v49 = vpop.permute.xlu0 %1314 }
 0x343   :  { %v1341_v44 = vsel %vm1340_vm4, %v1339_v43, %v1291_v39 }
 0x346   :  { %v1295_v45 = vpop.permute.xlu1 %1294  ;;  %v1323_v54 = vpop.permute.xlu0 %1322 }
 0x347   :  { %v1343_v46 = vsel %vm1342_vm5, %v1341_v44, %v1295_v45 }
 0x348   :  { %v1345_v47 = vsel %vm1344_vm6, %v1343_v46, %v1299_v20 }
 0x34a   :  { %v1303_v48 = vpop.permute.xlu1 %1302  ;;  %v1331_v60 = vpop.permute.xlu0 %1330 }
 0x34b   :  { %v1347_v50 = vsel %vm1346_vm7, %v1345_v47, %v1303_v48 }
 0x34c   :  { %v1349_v51 = vsel %vm1348_vm8, %v1347_v50, %v1307_v42 }
 0x34e   :  { %v1311_v52 = vpop.permute.xlu1 %1310 }
 0x34f   :  { %v1351_v53 = vsel %vm1350_vm9, %v1349_v51, %v1311_v52 }
 0x350   :  { %v1353_v55 = vsel %vm1352_vm10, %v1351_v53, %v1315_v49 }
 0x352   :  { %v1319_v56 = vpop.permute.xlu1 %1318 }
 0x353   :  { %v1355_v57 = vsel %vm1354_vm11, %v1353_v55, %v1319_v56 }
 0x354   :  { %v1357_v58 = vsel %vm1356_vm12, %v1355_v57, %v1323_v54 }
 0x356   :  { %v1327_v59 = vpop.permute.xlu1 %1326 }
 0x357   :  { %v1359_v61 = vsel %vm1358_vm13, %v1357_v58, %v1327_v59 }
 0x358   :  { %v1361_v62 = vsel %vm1360_vm14, %v1359_v61, %v1331_v60 }
 0x359   :  { %1362 = vst [vmem:[#allocation7] sm:$0xff] %v1361_v62 }
 0x35a   :  { %1496 = shalt.err (!%p1493_p6)
}
 0x35b   :  { %s1497_s24 = scalar_lea.hbm %s1758_s2, 128 }
 0x35c   :  { %p1498_p7 = scmp.ne.s32.totalorder %s1758_s2, %s1497_s24  ;;  %p1501_p8 = scmp.lt.u32.totalorder %s1497_s24, %s1758_s2 }
 0x35e   :  { %p1503_p9 = pnand %p1501_p8, %p1498_p7 }
 0x360   :  { %1506 = shalt.err (!%p1503_p9)
}
 0x361   :  { %1372 = dma.vmem_to_hbm [thread:$0]  %s1370_s20, 128, %s1758_s2, [#allocation4]  }
 0x362   :  { %1511 = dma.done.wait [#allocation4], 128  }
 0x363   :  { %1512 = vsyncadd [#allocation4], 4294967168 }
 0x364   :  { %1376 = vsyncpa [#allocation3], 1 }
 0x365   :  { %1377 = vsyncpa [#allocation6], 1 }
 0x366   :  { %1378 = vsyncpa [#allocation4], 1 }

</bundles_post_ra>
